<compile_context>
chip_gen: v5e
topology: v5e:2x2
jax: 0.10.0
libtpu: 0.0.40
codegen_flags: <defaults>
</compile_context>

<pallas_src>
import functools

import jax
import jax.numpy as jnp
from jax.experimental import pallas as pl
from jax.experimental.pallas import tpu as pltpu

LN_EPS = 1e-5                       # PyTorch nn.LayerNorm default eps
_INV_SQRT2 = 0.7071067811865476
_SQRT_2_OVER_PI = 0.7978845608028654


def _gelu(x, approx):
    if approx:
        # tanh approximation: transcendental goes to the EUP slot (frees VALU,
        # matters most on v5e).  Accuracy trade-off vs nn.GELU()'s exact erf.
        return 0.5 * x * (1.0 + jnp.tanh(_SQRT_2_OVER_PI * (x + 0.044715 * x * x * x)))
    # exact erf form == nn.GELU() default -> PyTorch parity.
    return 0.5 * x * (1.0 + jax.lax.erf(x * _INV_SQRT2))


def _round_up(n, m):
    return ((n + m - 1) // m) * m


def _vmem_capacity_bytes():
    try:
        return int(pltpu.get_tpu_info().vmem_capacity_bytes)
    except Exception:
        return 64 * 1024 * 1024      # conservative fallback (v7x per-TC VMEM)


def resnetff_kernel(x_ref, g_ref, b_ref, w1_ref, b1_ref, w2_ref, b2_ref,
                    o_ref, *scratch, weights_resident: bool,
                    acc_in_out: bool, approx_gelu: bool):
    """One grid step = one ff-block (depth index d) applied to one row tile."""
    acc_ref = o_ref if acc_in_out else scratch[0]
    d = pl.program_id(1)
    depth = pl.num_programs(1)

    @pl.when(d == 0)
    def _():
        acc_ref[...] = x_ref[...].astype(acc_ref.dtype)

    x = acc_ref[...].astype(jnp.float32)          # (tm, dim) residual, f32 math

    # LayerNorm over the feature axis.
    mean = jnp.mean(x, axis=-1, keepdims=True)
    cent = x - mean
    var = jnp.mean(cent * cent, axis=-1, keepdims=True)
    xn = cent * jax.lax.rsqrt(var + LN_EPS)
    xn = xn * g_ref[d] + b_ref[d]                 # (1, dim) broadcasts

    # Weight index: dynamic depth index when resident, 0 when streamed per depth.
    widx = d if weights_resident else 0

    # Linear(dim -> dim_hidden) + GELU: narrow operands, f32 MXU accumulation.
    h = jnp.dot(xn.astype(w1_ref.dtype), w1_ref[widx],
                preferred_element_type=jnp.float32) + b1_ref[d]
    h = _gelu(h, approx_gelu)

    # Linear(dim_hidden -> dim)
    y = jnp.dot(h.astype(w2_ref.dtype), w2_ref[widx],
                preferred_element_type=jnp.float32) + b2_ref[d]

    # Residual add: re-read the scratch here instead of keeping `x` live across
    # both matmuls + GELU (shorter live range -> less vreg pressure / spills).
    acc_ref[...] = (acc_ref[...].astype(jnp.float32) + y).astype(acc_ref.dtype)

    if not acc_in_out:
        @pl.when(d == depth - 1)
        def _():
            o_ref[...] = acc_ref[...].astype(o_ref.dtype)


def prepare_weights(w1, w2, dtype=jnp.bfloat16):
    """One-time weight cast, hoisted out of the jitted hot path (halves weight DMA)."""
    return w1.astype(dtype), w2.astype(dtype)


@functools.partial(jax.jit, static_argnames=("tm", "approx_gelu"))
def resnetff_forward(x, gamma, beta, w1, b1, w2, b2, *, tm=None, approx_gelu=False):
    """x: (..., dim). Params stacked over depth on the leading axis."""
    orig_shape = x.shape
    dim = orig_shape[-1]
    depth, _, dim_hidden = w1.shape

    N = 1
    for s in orig_shape[:-1]:
        N *= s
    x2 = x.reshape(N, dim)

    x_itemsize = jnp.dtype(x.dtype).itemsize
    w_itemsize = jnp.dtype(w1.dtype).itemsize
    acc_in_out = (x.dtype == jnp.float32)         # f32 output doubles as accumulator

    # ---- generation-aware VMEM budgeting (64 MiB v7x / 128 MiB v5e,v6e) -------
    cap = _vmem_capacity_bytes()
    budget = int(cap * 0.8)

    w_bytes = 2 * depth * dim * dim_hidden * w_itemsize       # W1 + W2, all depths
    small_bytes = depth * (3 * dim + dim_hidden) * 4          # gamma/beta/b1/b2

    def act_bytes(t):
        return (2 * t * dim * x_itemsize                      # x blocks (dbl-buffered)
                + 2 * t * dim * x_itemsize                    # output blocks
                + (0 if acc_in_out else t * dim * 4)          # f32 residual scratch
                + 2 * t * dim_hidden * 4                      # xn/h f32 intermediates
                + t * dim_hidden * w_itemsize)                # narrow h for 2nd matmul

    rows8 = _round_up(N, 8)
    min_tile = min(128, rows8)

    # Resident weights are single-buffered (constant index_map -> Buffered(1)),
    # so the residency test uses w_bytes once, not twice.
    weights_resident = (w_bytes + small_bytes + act_bytes(min_tile)) <= budget
    fixed_bytes = (w_bytes if weights_resident
                   else 2 * 2 * dim * dim_hidden * w_itemsize) + small_bytes
    # TODO(synk): if even the streamed per-depth (dim, dim_hidden) weight blocks
    # overflow VMEM (very large dim/dim_hidden), add a dim_hidden-slab grid axis.

    # ---- row tile selection ----------------------------------------------------
    cands = [tm] if tm is not None else [1024, 512, 256, 128]
    feasible = []
    for t in cands:
        te = min(_round_up(t, 8), rows8)
        if te not in feasible and fixed_bytes + act_bytes(te) <= budget:
            feasible.append(te)
    if not feasible:
        feasible = [min_tile]
    pads = {te: _round_up(N, te) for te in feasible}
    min_pad = min(pads.values())
    best = None
    for te in feasible:                            # descending tile size
        if pads[te] != min_pad:
            continue                               # never add padding for balance
        nt = pads[te] // te
        if nt == 1 or nt % 2 == 0:                 # even tile count: v7x 2-TC balance
            best = te
            break
    if best is None:
        best = max(te for te in feasible if pads[te] == min_pad)
    tm_eff = best
    N_pad = _round_up(N, tm_eff)
    n_row_tiles = N_pad // tm_eff

    if N_pad != N:
        x2 = jnp.pad(x2, ((0, N_pad - N), (0, 0)))

    # ---- VMEM limit: from footprint, never above physical VMEM ----------------
    vmem_est = fixed_bytes + act_bytes(tm_eff)
    vmem_limit = int(min(max(int(vmem_est * 1.3), 32 * 1024 * 1024), int(cap * 0.9)))

    # ---- BlockSpecs -------------------------------------------------------------
    single = pl.Buffered(1)        # constant index_map -> pipelining buys nothing
    if weights_resident:
        w1_spec = pl.BlockSpec((depth, dim, dim_hidden), lambda i, d: (0, 0, 0),
                               pipeline_mode=single)
        w2_spec = pl.BlockSpec((depth, dim_hidden, dim), lambda i, d: (0, 0, 0),
                               pipeline_mode=single)
    else:
        # Streamed per depth step (double-buffered so DMA overlaps the matmuls).
        w1_spec = pl.BlockSpec((1, dim, dim_hidden), lambda i, d: (d, 0, 0))
        w2_spec = pl.BlockSpec((1, dim_hidden, dim), lambda i, d: (d, 0, 0))

    gamma_spec = pl.BlockSpec((depth, 1, dim), lambda i, d: (0, 0, 0), pipeline_mode=single)
    beta_spec = pl.BlockSpec((depth, 1, dim), lambda i, d: (0, 0, 0), pipeline_mode=single)
    b1_spec = pl.BlockSpec((depth, 1, dim_hidden), lambda i, d: (0, 0, 0), pipeline_mode=single)
    b2_spec = pl.BlockSpec((depth, 1, dim), lambda i, d: (0, 0, 0), pipeline_mode=single)

    # ---- Cost estimate ----------------------------------------------------------
    flops = 4 * depth * N_pad * dim * dim_hidden
    transcendentals = depth * N_pad * dim_hidden
    weight_streams = 1 if weights_resident else n_row_tiles
    bytes_accessed = (2 * N_pad * dim * x_itemsize
                      + weight_streams * w_bytes + small_bytes)
    cost = pl.CostEstimate(flops=flops, transcendentals=transcendentals,
                           bytes_accessed=bytes_accessed)

    scratch_shapes = [] if acc_in_out else [pltpu.VMEM((tm_eff, dim), jnp.float32)]

    out = pl.pallas_call(
        functools.partial(resnetff_kernel,
                          weights_resident=weights_resident,
                          acc_in_out=acc_in_out,
                          approx_gelu=approx_gelu),
        out_shape=jax.ShapeDtypeStruct((N_pad, dim), x.dtype),
        grid_spec=pltpu.PrefetchScalarGridSpec(
            num_scalar_prefetch=0,
            grid=(n_row_tiles, depth),
            in_specs=[
                pl.BlockSpec((tm_eff, dim), lambda i, d: (i, 0)),   # x rows
                gamma_spec, beta_spec, w1_spec, b1_spec, w2_spec, b2_spec,
            ],
            out_specs=pl.BlockSpec((tm_eff, dim), lambda i, d: (i, 0)),
            scratch_shapes=scratch_shapes,
        ),
        compiler_params=pltpu.CompilerParams(
            dimension_semantics=("parallel", "arbitrary"),
            vmem_limit_bytes=vmem_limit,
        ),
        cost_estimate=cost,
    )(x2, gamma, beta, w1, b1, w2, b2)

    if N_pad != N:
        out = out[:N]
    return out.reshape(orig_shape)


def ref_forward(x, gamma, beta, w1, b1, w2, b2):
    """Pure-JAX f32 reference matching the PyTorch forward."""
    depth = w1.shape[0]
    for d in range(depth):
        x_ = x
        mean = jnp.mean(x, axis=-1, keepdims=True)
        var = jnp.mean((x - mean) ** 2, axis=-1, keepdims=True)
        xn = (x - mean) * jax.lax.rsqrt(var + LN_EPS)
        xn = xn * gamma[d, 0] + beta[d, 0]
        h = _gelu(xn @ w1[d] + b1[d, 0], approx=False)
        y = h @ w2[d] + b2[d, 0]
        x = y + x_
    return x


def init_params(key, dim, dim_hidden, depth):
    """Deterministic synthetic init (shapes match nn.LayerNorm / nn.Linear)."""
    ks = jax.random.split(key, 4)
    gamma = jnp.ones((depth, 1, dim), jnp.float32)        # LayerNorm weight
    beta = jnp.zeros((depth, 1, dim), jnp.float32)        # LayerNorm bias
    s1 = 1.0 / jnp.sqrt(dim)
    s2 = 1.0 / jnp.sqrt(dim_hidden)
    w1 = jax.random.uniform(ks[0], (depth, dim, dim_hidden), jnp.float32, -s1, s1)
    b1 = jax.random.uniform(ks[1], (depth, 1, dim_hidden), jnp.float32, -s1, s1)
    w2 = jax.random.uniform(ks[2], (depth, dim_hidden, dim), jnp.float32, -s2, s2)
    b2 = jax.random.uniform(ks[3], (depth, 1, dim), jnp.float32, -s2, s2)
    return gamma, beta, w1, b1, w2, b2


if __name__ == "__main__":
    # Small, lane-dense shapes (dim multiple of 128 keeps stores unmasked).
    B, S, dim, dim_hidden, depth = 2, 8, 128, 256, 3

    key = jax.random.PRNGKey(0)
    kx, kp = jax.random.split(key)
    x = jax.random.normal(kx, (B, S, dim), jnp.float32)
    gamma, beta, w1, b1, w2, b2 = init_params(kp, dim, dim_hidden, depth)

    # One-time bf16 weight cast OUTSIDE the jitted forward (hot-path hoist).
    w1b, w2b = prepare_weights(w1, w2)

    out = resnetff_forward(x, gamma, beta, w1b, b1, w2b, b2)
    out = jax.block_until_ready(out)

    expected = ref_forward(x, gamma, beta, w1, b1, w2, b2)
    assert out.shape == (B, S, dim)
    max_err = float(jnp.max(jnp.abs(out - expected)))
    # bf16 matmul operands with f32 accumulation -> loosened tolerance vs f32 ref.
    assert jnp.allclose(out, expected, atol=3e-2, rtol=3e-2), max_err
    print("KERNEL_OK")
</pallas_src>

<mosaic_0001>
module attributes {stable_mosaic.version = 11 : i64} {
  func.func @resnetff_kernel(%arg0: i32, %arg1: i32, %arg2: memref<16x128xf32, #tpu.memory_space<vmem>>, %arg3: memref<3x1x128xf32, #tpu.memory_space<vmem>>, %arg4: memref<3x1x128xf32, #tpu.memory_space<vmem>>, %arg5: memref<3x128x256xbf16, #tpu.memory_space<vmem>>, %arg6: memref<3x1x256xf32, #tpu.memory_space<vmem>>, %arg7: memref<3x256x128xbf16, #tpu.memory_space<vmem>>, %arg8: memref<3x1x128xf32, #tpu.memory_space<vmem>>, %arg9: memref<16x128xf32, #tpu.memory_space<vmem>>) attributes {dimension_semantics = [#tpu.dimension_semantics<parallel>, #tpu.dimension_semantics<arbitrary>], iteration_bounds = array<i64: 1, 3>, scalar_prefetch = 0 : i64, scratch_operands = 0 : i64, tpu.core_type = #tpu.core_type<tc>, window_params = [{transform_indices = @transform_0, window_bounds = array<i64: 16, 128>}, {pipeline_mode = #tpu.pipeline_mode<synchronous>, transform_indices = @transform_1, window_bounds = array<i64: 3, 1, 128>}, {pipeline_mode = #tpu.pipeline_mode<synchronous>, transform_indices = @transform_2, window_bounds = array<i64: 3, 1, 128>}, {pipeline_mode = #tpu.pipeline_mode<synchronous>, transform_indices = @transform_3, window_bounds = array<i64: 3, 128, 256>}, {pipeline_mode = #tpu.pipeline_mode<synchronous>, transform_indices = @transform_4, window_bounds = array<i64: 3, 1, 256>}, {pipeline_mode = #tpu.pipeline_mode<synchronous>, transform_indices = @transform_5, window_bounds = array<i64: 3, 256, 128>}, {pipeline_mode = #tpu.pipeline_mode<synchronous>, transform_indices = @transform_6, window_bounds = array<i64: 3, 1, 128>}, {transform_indices = @transform_7, window_bounds = array<i64: 16, 128>}]} {
    %c0_i32 = arith.constant 0 : i32
    %0 = arith.cmpi eq, %arg1, %c0_i32 : i32
    %1 = arith.extui %0 : i1 to i32
    %c0_i32_0 = arith.constant 0 : i32
    %2 = arith.cmpi ne, %1, %c0_i32_0 : i32
    scf.if %2 {
      %c0_27 = arith.constant 0 : index
      %c0_28 = arith.constant 0 : index
      %61 = vector.load %arg2[%c0_27, %c0_28] : memref<16x128xf32, #tpu.memory_space<vmem>>, vector<16x128xf32>
      %c0_29 = arith.constant 0 : index
      %c0_30 = arith.constant 0 : index
      %62 = vector.load %arg9[%c0_29, %c0_30] : memref<16x128xf32, #tpu.memory_space<vmem>>, vector<16x128xf32>
      tpu.vector_store %arg9[%c0_29, %c0_30], %61 {strides = array<i32>} : memref<16x128xf32, #tpu.memory_space<vmem>>, vector<16x128xf32>,
    } else {
    }
    %c0 = arith.constant 0 : index
    %c0_1 = arith.constant 0 : index
    %3 = vector.load %arg9[%c0, %c0_1] : memref<16x128xf32, #tpu.memory_space<vmem>>, vector<16x128xf32>
    %cst = arith.constant dense<0.000000e+00> : vector<16xf32>
    %4 = vector.multi_reduction <add>, %3, %cst [1] : vector<16x128xf32> to vector<16xf32>
    %5 = vector.shape_cast %4 : vector<16xf32> to vector<16x1xf32>
    %cst_2 = arith.constant 1.280000e+02 : f32
    %6 = vector.broadcast %cst_2 : f32 to vector<16x1xf32>
    %7 = arith.divf %5, %6 : vector<16x1xf32>
    %8 = vector.broadcast %7 : vector<16x1xf32> to vector<16x128xf32>
    %9 = arith.subf %3, %8 : vector<16x128xf32>
    %10 = arith.mulf %9, %9 : vector<16x128xf32>
    %cst_3 = arith.constant dense<0.000000e+00> : vector<16xf32>
    %11 = vector.multi_reduction <add>, %10, %cst_3 [1] : vector<16x128xf32> to vector<16xf32>
    %12 = vector.shape_cast %11 : vector<16xf32> to vector<16x1xf32>
    %cst_4 = arith.constant 1.280000e+02 : f32
    %13 = vector.broadcast %cst_4 : f32 to vector<16x1xf32>
    %14 = arith.divf %12, %13 : vector<16x1xf32>
    %cst_5 = arith.constant 9.99999974E-6 : f32
    %15 = vector.broadcast %cst_5 : f32 to vector<16x1xf32>
    %16 = arith.addf %14, %15 : vector<16x1xf32>
    %17 = math.rsqrt %16 : vector<16x1xf32>
    %18 = vector.broadcast %17 : vector<16x1xf32> to vector<16x128xf32>
    %19 = arith.mulf %9, %18 : vector<16x128xf32>
    %20 = arith.index_cast %arg1 : i32 to index
    %c0_6 = arith.constant 0 : index
    %c0_7 = arith.constant 0 : index
    %21 = vector.load %arg3[%20, %c0_6, %c0_7] : memref<3x1x128xf32, #tpu.memory_space<vmem>>, vector<1x1x128xf32>
    %22 = vector.shape_cast %21 : vector<1x1x128xf32> to vector<1x128xf32>
    %23 = vector.broadcast %22 : vector<1x128xf32> to vector<16x128xf32>
    %24 = arith.mulf %19, %23 : vector<16x128xf32>
    %25 = arith.index_cast %arg1 : i32 to index
    %c0_8 = arith.constant 0 : index
    %c0_9 = arith.constant 0 : index
    %26 = vector.load %arg4[%25, %c0_8, %c0_9] : memref<3x1x128xf32, #tpu.memory_space<vmem>>, vector<1x1x128xf32>
    %27 = vector.shape_cast %26 : vector<1x1x128xf32> to vector<1x128xf32>
    %28 = vector.broadcast %27 : vector<1x128xf32> to vector<16x128xf32>
    %29 = arith.addf %24, %28 : vector<16x128xf32>
    %30 = arith.truncf %29 : vector<16x128xf32> to vector<16x128xbf16>
    %31 = arith.index_cast %arg1 : i32 to index
    %c0_10 = arith.constant 0 : index
    %c0_11 = arith.constant 0 : index
    %32 = vector.load %arg5[%31, %c0_10, %c0_11] : memref<3x128x256xbf16, #tpu.memory_space<vmem>>, vector<1x128x256xbf16>
    %33 = vector.shape_cast %32 : vector<1x128x256xbf16> to vector<128x256xbf16>
    %cst_12 = arith.constant dense<0.000000e+00> : vector<16x256xf32>
    %34 = tpu.matmul %30, %33, %cst_12 {dimension_numbers = #tpu.dot_dimension_numbers<[1], [0], [0], [1], [0, 0, 1, 1], [], []>} : vector<16x128xbf16>, vector<128x256xbf16>, vector<16x256xf32> -> vector<16x256xf32>
    %35 = arith.index_cast %arg1 : i32 to index
    %c0_13 = arith.constant 0 : index
    %c0_14 = arith.constant 0 : index
    %36 = vector.load %arg6[%35, %c0_13, %c0_14] : memref<3x1x256xf32, #tpu.memory_space<vmem>>, vector<1x1x256xf32>
    %37 = vector.shape_cast %36 : vector<1x1x256xf32> to vector<1x256xf32>
    %38 = vector.broadcast %37 : vector<1x256xf32> to vector<16x256xf32>
    %39 = arith.addf %34, %38 : vector<16x256xf32>
    %cst_15 = arith.constant 5.000000e-01 : f32
    %40 = vector.broadcast %cst_15 : f32 to vector<16x256xf32>
    %41 = arith.mulf %40, %39 : vector<16x256xf32>
    %cst_16 = arith.constant 0.707106769 : f32
    %42 = vector.broadcast %cst_16 : f32 to vector<16x256xf32>
    %43 = arith.mulf %39, %42 : vector<16x256xf32>
    %44 = math.erf %43 : vector<16x256xf32>
    %cst_17 = arith.constant 1.000000e+00 : f32
    %45 = vector.broadcast %cst_17 : f32 to vector<16x256xf32>
    %46 = arith.addf %45, %44 : vector<16x256xf32>
    %47 = arith.mulf %41, %46 : vector<16x256xf32>
    %48 = arith.truncf %47 : vector<16x256xf32> to vector<16x256xbf16>
    %49 = arith.index_cast %arg1 : i32 to index
    %c0_18 = arith.constant 0 : index
    %c0_19 = arith.constant 0 : index
    %50 = vector.load %arg7[%49, %c0_18, %c0_19] : memref<3x256x128xbf16, #tpu.memory_space<vmem>>, vector<1x256x128xbf16>
    %51 = vector.shape_cast %50 : vector<1x256x128xbf16> to vector<256x128xbf16>
    %cst_20 = arith.constant dense<0.000000e+00> : vector<16x128xf32>
    %52 = tpu.matmul %48, %51, %cst_20 {dimension_numbers = #tpu.dot_dimension_numbers<[1], [0], [0], [1], [0, 0, 1, 1], [], []>} : vector<16x256xbf16>, vector<256x128xbf16>, vector<16x128xf32> -> vector<16x128xf32>
    %53 = arith.index_cast %arg1 : i32 to index
    %c0_21 = arith.constant 0 : index
    %c0_22 = arith.constant 0 : index
    %54 = vector.load %arg8[%53, %c0_21, %c0_22] : memref<3x1x128xf32, #tpu.memory_space<vmem>>, vector<1x1x128xf32>
    %55 = vector.shape_cast %54 : vector<1x1x128xf32> to vector<1x128xf32>
    %56 = vector.broadcast %55 : vector<1x128xf32> to vector<16x128xf32>
    %57 = arith.addf %52, %56 : vector<16x128xf32>
    %c0_23 = arith.constant 0 : index
    %c0_24 = arith.constant 0 : index
    %58 = vector.load %arg9[%c0_23, %c0_24] : memref<16x128xf32, #tpu.memory_space<vmem>>, vector<16x128xf32>
    %59 = arith.addf %58, %57 : vector<16x128xf32>
    %c0_25 = arith.constant 0 : index
    %c0_26 = arith.constant 0 : index
    %60 = vector.load %arg9[%c0_25, %c0_26] : memref<16x128xf32, #tpu.memory_space<vmem>>, vector<16x128xf32>
    tpu.vector_store %arg9[%c0_25, %c0_26], %59 {strides = array<i32>} : memref<16x128xf32, #tpu.memory_space<vmem>>, vector<16x128xf32>,
    return
  }
  func.func @transform_0(%arg0: i32, %arg1: i32) -> (i32, i32) {
    %c0_i32 = arith.constant 0 : i32
    %c0_i32_0 = arith.constant 0 : i32
    return %arg0, %c0_i32 : i32, i32
  }
  func.func @transform_1(%arg0: i32, %arg1: i32) -> (i32, i32, i32) {
    %c0_i32 = arith.constant 0 : i32
    %c0_i32_0 = arith.constant 0 : i32
    %c0_i32_1 = arith.constant 0 : i32
    %c0_i32_2 = arith.constant 0 : i32
    return %c0_i32, %c0_i32_0, %c0_i32_1 : i32, i32, i32
  }
  func.func @transform_2(%arg0: i32, %arg1: i32) -> (i32, i32, i32) {
    %c0_i32 = arith.constant 0 : i32
    %c0_i32_0 = arith.constant 0 : i32
    %c0_i32_1 = arith.constant 0 : i32
    %c0_i32_2 = arith.constant 0 : i32
    return %c0_i32, %c0_i32_0, %c0_i32_1 : i32, i32, i32
  }
  func.func @transform_3(%arg0: i32, %arg1: i32) -> (i32, i32, i32) {
    %c0_i32 = arith.constant 0 : i32
    %c0_i32_0 = arith.constant 0 : i32
    %c0_i32_1 = arith.constant 0 : i32
    %c0_i32_2 = arith.constant 0 : i32
    return %c0_i32, %c0_i32_0, %c0_i32_1 : i32, i32, i32
  }
  func.func @transform_4(%arg0: i32, %arg1: i32) -> (i32, i32, i32) {
    %c0_i32 = arith.constant 0 : i32
    %c0_i32_0 = arith.constant 0 : i32
    %c0_i32_1 = arith.constant 0 : i32
    %c0_i32_2 = arith.constant 0 : i32
    return %c0_i32, %c0_i32_0, %c0_i32_1 : i32, i32, i32
  }
  func.func @transform_5(%arg0: i32, %arg1: i32) -> (i32, i32, i32) {
    %c0_i32 = arith.constant 0 : i32
    %c0_i32_0 = arith.constant 0 : i32
    %c0_i32_1 = arith.constant 0 : i32
    %c0_i32_2 = arith.constant 0 : i32
    return %c0_i32, %c0_i32_0, %c0_i32_1 : i32, i32, i32
  }
  func.func @transform_6(%arg0: i32, %arg1: i32) -> (i32, i32, i32) {
    %c0_i32 = arith.constant 0 : i32
    %c0_i32_0 = arith.constant 0 : i32
    %c0_i32_1 = arith.constant 0 : i32
    %c0_i32_2 = arith.constant 0 : i32
    return %c0_i32, %c0_i32_0, %c0_i32_1 : i32, i32, i32
  }
  func.func @transform_7(%arg0: i32, %arg1: i32) -> (i32, i32) {
    %c0_i32 = arith.constant 0 : i32
    %c0_i32_0 = arith.constant 0 : i32
    return %arg0, %c0_i32 : i32, i32
  }
}

</mosaic_0001>

<bundles_post_ra>
// kernel: resnetff_forward.1
= control target key start
LH: loop header
LB: loop body
LE: loop exit
PB: predicated region body
PF: predicated region fallthrough
CT: control target
= control target key end

     0   :  { %s1979_s0 = inlined_call_operand.hbm [shape: f32[16,128], index: 0, kind: input, shape index: {}]   ;;  %s1980_s1 = inlined_call_operand.hbm [shape: f32[3,1,128], index: 1, kind: input, shape index: {}]   ;;  %s1981_s2 = inlined_call_operand.hbm [shape: f32[3,1,128], index: 2, kind: input, shape index: {}]   ;;  %s1982_s3 = inlined_call_operand.hbm [shape: bf16[3,128,256], index: 3, kind: input, shape index: {}]   ;;  %s1983_s4 = inlined_call_operand.hbm [shape: f32[3,1,256], index: 4, kind: input, shape index: {}]   ;;  %s1984_s5 = inlined_call_operand.hbm [shape: bf16[3,256,128], index: 5, kind: input, shape index: {}]   ;;  %s1985_s6 = inlined_call_operand.vmem [shape: f32[3,1,128], index: 6, kind: input, shape index: {}]   ;;  %s1986_s7 = inlined_call_operand.hbm [shape: f32[16,128], index: 7, kind: output, shape index: {}]  }
   0x1   :  { %1988 = sst [smem:[#allocation19_spill]] %s1979_s0 }
   0x2   :  { %12 = vsyncpa [#allocation3], 0 }
   0x3   :  { %13 = vsyncpa [#allocation6], 0 }
   0x4   :  { %14 = vsyncpa [#allocation9], 0 }
   0x5   :  { %15 = vsyncpa [#allocation12], 0 }
   0x6   :  { %16 = vsyncpa [#allocation4], 0  ;;  %s1667_s24 = smov 0   ;;  %s1669_s25 = smov 0  }
   0x7   :  { %s1671_s26 = smov 0  }
   0x8 LB: > { %s245_s29 = sshll.u32 %s1980_s1, 4  ;;  %s1987_s30 = sadd.s32 4294967295, %s1607_s26   ;;  %s1607_s26 = sphi %s1671_s26, %s22_s26   ;;  %s1603_s25 = sphi %s1669_s25, %s1997_s25   ;;  %s1599_s24 = sphi %s1667_s24, %s1996_s24   ;;  %s246_s29 = int_to_ptr.hbm [resolvable:$true] %s245_s29 }
   0x9   : > { %p1048_p0 = scmp.ge.s32.totalorder %s1607_s26, 1  ;;  %p217_p1 = scmp.lt.s32.totalorder %s1607_s26, 4 }
   0xa   : > { %p1690_p2 = scmp.eq.s32.totalorder %s1987_s30, 0  ;;  %s1609_s10 = smov [#allocation5]  }
   0xb   : > { %p1694_p3 = pnand %p1048_p0, %p217_p1  ;;  %s247_s11 = sshll.u32 %s1609_s10, 4  ;;  %s248_s11 = int_to_ptr.vmem [resolvable:$true] %s247_s11 }
   0xc   : > { %s273_s15 = sshll.u32 %s1982_s3, 4  ;;  %s1610_s16 = smov [#allocation8]   ;;  %s274_s15 = int_to_ptr.hbm [resolvable:$true] %s273_s15 }
   0xd   : > { %p1265_p4 = pneg %p1694_p3  ;;  %s275_s17 = sshll.u32 %s1610_s16, 4  ;;  %s276_s17 = int_to_ptr.vmem [resolvable:$true] %s275_s17 }
   0xe   : > { %s1611_s18 = smov 16   ;;  %s1612_s19 = smov 1  }
   0xf   : > { %p1702_p5 = pnand %p1690_p2, %p1265_p4  ;;  %s1613_s20 = smov 128  }
  0x10   : > { %s1614_s21 = smov 8   ;;  %s1992_s0 = sld [smem:[#allocation19_spill]] }
  0x11   : > { %1271 = dma.hbm_to_vmem [thread:$0]  (!%p1702_p5), %s246_s29, 48, %s248_s11, [#allocation6], %s1611_s18, %s1611_s18, %s1612_s19  }
  0x12   : > { %1277 = dma.hbm_to_vmem [thread:$0]  (!%p1702_p5), %s274_s15, 6144, %s276_s17, [#allocation9], %s1613_s20, %s1613_s20, %s1614_s21  }
  0x13   : > { %s31_s28 = sadd.s32 1, %s1603_s25  ;;  %s1615_s10 = smov [#allocation2]  }
  0x14   : > { %p32_p6 = scmp.ge.s32.totalorder %s31_s28, 3  ;;  %s233_s13 = sshll.u32 %s1615_s10, 4  ;;  %s234_s13 = int_to_ptr.vmem [resolvable:$true] %s233_s13 }
  0x15   : > { %s259_s30 = sshll.u32 %s1981_s2, 4  ;;  %s287_s15 = sshll.u32 %s1983_s4, 4  ;;  %s260_s30 = int_to_ptr.hbm [resolvable:$true] %s259_s30  ;;  %s288_s15 = int_to_ptr.hbm [resolvable:$true] %s287_s15 }
  0x16   : > { %s231_s27 = sshll.u32 %s1992_s0, 4  ;;  %s1999_s28 = smov (%p32_p6, %s31_s28), 0  ;;  %s232_s27 = int_to_ptr.hbm [resolvable:$true] %s231_s27 }
  0x17   : > { %1268 = dma.hbm_to_vmem [thread:$0]  (!%p1702_p5), %s232_s27, 256, %s234_s13, [#allocation3], %s1613_s20, %s1613_s20, %s1614_s21  }
  0x18   : > { %s1616_s17 = smov [#allocation7]   ;;  %s1617_s23 = smov [#allocation10]  }
  0x19   : > { %s261_s22 = sshll.u32 %s1616_s17, 4  ;;  %s289_s10 = sshll.u32 %s1617_s23, 4  ;;  %s262_s22 = int_to_ptr.vmem [resolvable:$true] %s261_s22  ;;  %s290_s10 = int_to_ptr.vmem [resolvable:$true] %s289_s10 }
  0x1a   : > { %1274 = dma.hbm_to_vmem [thread:$0]  (!%p1702_p5), %s260_s30, 48, %s262_s22, [#allocation6], %s1611_s18, %s1611_s18, %s1612_s19  }
  0x1b   : > { %s1618_s14 = smov 32   ;;  %s1619_s16 = smov 2  }
  0x1c   : > { %1280 = dma.hbm_to_vmem [thread:$0]  (!%p1702_p5), %s288_s15, 96, %s290_s10, [#allocation9], %s1618_s14, %s1618_s14, %s1619_s16  }
  0x1d   : > { %s301_s21 = sshll.u32 %s1984_s5, 4  ;;  %s1620_s27 = smov [#allocation11]   ;;  %s302_s21 = int_to_ptr.hbm [resolvable:$true] %s301_s21 }
  0x1e   : > { %s303_s13 = sshll.u32 %s1620_s27, 4  ;;  %s1621_s29 = smov 64   ;;  %s304_s13 = int_to_ptr.vmem [resolvable:$true] %s303_s13 }
  0x1f   : > { %s1622_s11 = smov 4   ;;  %322 = sbr.rel (%p1694_p3) target bundleno = 674 (0x2a2), region = 48 }
  0x20   : > { %1283 = dma.hbm_to_vmem [thread:$0]  (!%p1702_p5), %s302_s21, 6144, %s304_s13, [#allocation12], %s1621_s29, %s1621_s29, %s1622_s11  }
  0x24   : > { %1578 = dma.done.wait (%p1690_p2), [#allocation3], 256  }
  0x25   : > { %1580 = vsyncadd (%p1690_p2), [#allocation3], 4294967040 }
  0x26   : > { %1582 = dma.done.wait (%p1690_p2), [#allocation6], 96  }
  0x27   : > { %1584 = vsyncadd (%p1690_p2), [#allocation6], 4294967200 }
  0x28   : > { %1586 = dma.done.wait (%p1690_p2), [#allocation9], 6240  }
  0x29   : > { %1588 = vsyncadd (%p1690_p2), [#allocation9], 4294961056 }
  0x2a   : > { %1590 = dma.done.wait (%p1690_p2), [#allocation12], 6144  }
  0x2b   : > { %1592 = vsyncadd (%p1690_p2), [#allocation12], 4294961152  ;;  %p1062_p7 = scmp.ne.s32.totalorder %s1599_s24, 0 }
  0x2d   : > { %375 = sbr.rel (%p1062_p7) target bundleno = 53 (0x35), region = 76 }
  0x32   : > { %v376_v0 = vld [vmem:[#allocation2] sm:$0xff]  ;;  %v377_v1 = vld [vmem:[#allocation2 + $0x8] sm:$0xff] }
  0x33   : > { %378 = vst [vmem:[#allocation13] sm:$0xff] %v376_v0 }
  0x34   : > { %379 = vst [vmem:[#allocation13 + $0x8] sm:$0xff] %v377_v1 }
  0x35 PF: > { %v1623_v4 = vmov 128.0   ;;  %s429_s0 = scalar_lea.vmem [#allocation5], %s1599_s24  ;;  %s436_s30 = scalar_lea.vmem [#allocation7], %s1599_s24 }
  0x36   : > { %1343 = vrcp.f32 %v1623_v4  ;;  %s1203_s8 = sshll.u32 %s1599_s24, 7  ;;  %s791_s19 = scalar_lea.vmem %s1985_s6, %s1599_s24 }
  0x37   : > { %s1780_s9 = scalar_lea.vmem [#allocation8], %s1203_s8  ;;  %s1065_s15 = sshll.u32 %s1599_s24, 1 }
  0x38   : > { %v1124_v19 = vld [vmem:[%s1780_s9 + $0x70] sm:$0xf]  ;;  %v1219_v20 = vld [vmem:[%s1780_s9 + $0x74] sm:$0xf0]  ;;  %v1218_v21 = vld [vmem:[%s1780_s9 + $0x74] sm:$0xf] }
  0x39   : > { %v1125_v22 = vor.u32 %v1219_v20, %v1124_v19  ;;  %v1126_v23 = vld [vmem:[%s1780_s9 + $0x78] sm:$0xf0]  ;;  %v1116_v25 = vld [vmem:[%s1780_s9 + $0x60] sm:$0xf]  ;;  %v1217_v26 = vld [vmem:[%s1780_s9 + $0x64] sm:$0xf0] }
  0x3a   : > { %v1755_v2 = vld [vmem:[#allocation13] sm:$0xff]  ;;  %v1129_v24 = vor.u32 %v1218_v21, %v1126_v23  ;;  %v1117_v28 = vor.u32 %v1217_v26, %v1116_v25  ;;  %v1118_v29 = vld [vmem:[%s1780_s9 + $0x68] sm:$0xf0]  ;;  %v1108_v31 = vld [vmem:[%s1780_s9 + $0x50] sm:$0xf]  ;;  %s464_s17 = scalar_lea.vmem [#allocation10], %s1065_s15 }
  0x3b   : > { %382 = vadd.xlane.f32.xlu0 %v1755_v2  ;;  %v1758_v3 = vld [vmem:[#allocation13 + $0x8] sm:$0xff]  ;;  %551 = vmatpush.bf16.msra.mxu0 %v1125_v22  ;;  %v1215_v32 = vld [vmem:[%s1780_s9 + $0x54] sm:$0xf0]  ;;  %v1214_v33 = vld [vmem:[%s1780_s9 + $0x54] sm:$0xf]  ;;  %s1829_s22 = scalar_lea.vmem [#allocation11], %s1203_s8 }
  0x3c   : > { %v1344_v5 = vpop.eup %1343  ;;  %565 = vmatpush.bf16.msra.mxu1 %v1129_v24  ;;  %v1216_v27 = vld [vmem:[%s1780_s9 + $0x64] sm:$0xf]  ;;  %v1109_v34 = vor.u32 %v1215_v32, %v1108_v31  ;;  %v1110_v35 = vld [vmem:[%s1780_s9 + $0x58] sm:$0xf0]  ;;  %v1100_v37 = vld [vmem:[%s1780_s9 + $0x40] sm:$0xf] }
  0x3d   : > { %v387_v6 = vmul.f32 128.0, %v1344_v5  ;;  %vm391_vm0 = vweird.f32 %v1344_v5  ;;  %v1121_v30 = vor.u32 %v1216_v27, %v1118_v29  ;;  %v1113_v36 = vor.u32 %v1214_v33, %v1110_v35  ;;  %v1213_v38 = vld [vmem:[%s1780_s9 + $0x44] sm:$0xf0]  ;;  %v1212_v39 = vld [vmem:[%s1780_s9 + $0x44] sm:$0xf]  ;;  %s1624_s14 = smov [#allocation13]  }
  0x3e   : > { %v1101_v40 = vor.u32 %v1213_v38, %v1100_v37  ;;  %v1102_v41 = vld [vmem:[%s1780_s9 + $0x48] sm:$0xf0]  ;;  %v1092_v43 = vld [vmem:[%s1780_s9 + $0x30] sm:$0xf]  ;;  %v1211_v44 = vld [vmem:[%s1780_s9 + $0x34] sm:$0xf0] }
  0x3f   : > { %v388_v7 = vsub.f32 1.0, %v387_v6  ;;  %552 = vmatpush.bf16.msra.mxu0 %v1117_v28  ;;  %v1105_v42 = vor.u32 %v1212_v39, %v1102_v41  ;;  %v1210_v45 = vld [vmem:[%s1780_s9 + $0x34] sm:$0xf]  ;;  %v1093_v46 = vor.u32 %v1211_v44, %v1092_v43  ;;  %v1094_v47 = vld [vmem:[%s1780_s9 + $0x38] sm:$0xf0]  ;;  %s932_s16 = sshll.u32 %s1624_s14, 4  ;;  %s933_s16 = int_to_ptr.vmem [resolvable:$true] %s932_s16 }
  0x40   : > { %566 = vmatpush.bf16.msra.mxu1 %v1121_v30  ;;  %v1097_v48 = vor.u32 %v1210_v45, %v1094_v47  ;;  %v1084_v49 = vld [vmem:[%s1780_s9 + $0x20] sm:$0xf]  ;;  %v1209_v50 = vld [vmem:[%s1780_s9 + $0x24] sm:$0xf0]  ;;  %v1208_v51 = vld [vmem:[%s1780_s9 + $0x24] sm:$0xf] }
  0x41   : > { %v389_v8 = vmul.f32 %v1344_v5, %v388_v7  ;;  %v1085_v52 = vor.u32 %v1209_v50, %v1084_v49  ;;  %v1086_v53 = vld [vmem:[%s1780_s9 + $0x28] sm:$0xf0]  ;;  %v1076_v55 = vld [vmem:[%s1780_s9 + $0x10] sm:$0xf]  ;;  %v1207_v56 = vld [vmem:[%s1780_s9 + $0x14] sm:$0xf0] }
  0x42   : > { %v1089_v54 = vor.u32 %v1208_v51, %v1086_v53  ;;  %v1206_v57 = vld [vmem:[%s1780_s9 + $0x14] sm:$0xf]  ;;  %v1077_v58 = vor.u32 %v1207_v56, %v1076_v55  ;;  %v1078_v59 = vld [vmem:[%s1780_s9 + $0x18] sm:$0xf0]  ;;  %v1068_v60 = vld [vmem:[%s1780_s9] sm:$0xf] }
  0x43   : > { %384 = vadd.xlane.f32.xlu0 %v1758_v3  ;;  %v390_v9 = vadd.f32 %v1344_v5, %v389_v8  ;;  %553 = vmatpush.bf16.msra.mxu0 %v1109_v34  ;;  %v1205_v61 = vld [vmem:[%s1780_s9 + $0x4] sm:$0xf0]  ;;  %v1081_v62 = vor.u32 %v1206_v57, %v1078_v59  ;;  %v1204_v63 = vld [vmem:[%s1780_s9 + $0x4] sm:$0xf]  ;;  %v1070_v0 = vld [vmem:[%s1780_s9 + $0x8] sm:$0xf0] }
  0x44   : > { %567 = vmatpush.bf16.msra.mxu1 %v1113_v36  ;;  %v1069_v4 = vor.u32 %v1205_v61, %v1068_v60  ;;  %v1073_v6 = vor.u32 %v1204_v63, %v1070_v0  ;;  %v1340_v26 = vld [vmem:[%s429_s0] ss:$0 sm:$0xff]  ;;  %v1228_v39 = vld [vmem:[%s1829_s22 + $0x38] sm:$0xff]  ;;  %v1227_v45 = vld [vmem:[%s1829_s22 + $0x30] sm:$0xff]  ;;  %s934_s27 = sshll.u32 %s1986_s7, 4  ;;  %s1995_s13 = sadd.s32 4294967295, %s1607_s26   ;;  %s935_s27 = int_to_ptr.hbm [resolvable:$true] %s934_s27 }
  0x45   : > { %v1761_v10 = vsel %vm391_vm0, %v1344_v5, %v390_v9  ;;  %v1341_v31 = vld [vmem:[%s436_s30] ss:$0 sm:$0xff]  ;;  %892 = vmatpush.bf16.msra.mxu2 %v1228_v39  ;;  %v1226_v49 = vld [vmem:[%s1829_s22 + $0x28] sm:$0xff]  ;;  %p1296_p8 = scmp.eq.s32.totalorder %s1995_s13, 2  ;;  %s1625_s24 = smov 128  }
  0x46   : > { %v1234_v50 = vld [vmem:[%s1829_s22 + $0x68] sm:$0xff]  ;;  %v1233_v59 = vld [vmem:[%s1829_s22 + $0x60] sm:$0xff]  ;;  %s1626_s29 = smov 8  }
  0x47   : > { %554 = vmatpush.bf16.msra.mxu0 %v1101_v40  ;;  %v1236_v40 = vld [vmem:[%s1829_s22 + $0x78] sm:$0xff] }
  0x48   : > { %568 = vmatpush.bf16.msra.mxu1 %v1105_v42  ;;  %906 = vmatpush.bf16.msra.mxu3 %v1236_v40 }
  0x49   : > { %893 = vmatpush.bf16.msra.mxu2 %v1227_v45  ;;  %v1221_v45 = vld [vmem:[%s1829_s22] sm:$0xff] }
  0x4b   : > { %555 = vmatpush.bf16.msra.mxu0 %v1093_v46  ;;  %v1235_v46 = vld [vmem:[%s1829_s22 + $0x70] sm:$0xff] }
  0x4c   : > { %569 = vmatpush.bf16.msra.mxu1 %v1097_v48  ;;  %907 = vmatpush.bf16.msra.mxu3 %v1235_v46  ;;  %v1229_v46 = vld [vmem:[%s1829_s22 + $0x40] sm:$0xff] }
  0x4d   : > { %894 = vmatpush.bf16.msra.mxu2 %v1226_v49 }
  0x4f   : > { %556 = vmatpush.bf16.msra.mxu0 %v1085_v52 }
  0x50   : > { %570 = vmatpush.bf16.msra.mxu1 %v1089_v54  ;;  %908 = vmatpush.bf16.msra.mxu3 %v1234_v50 }
  0x53   : > { %557 = vmatpush.bf16.msra.mxu0 %v1077_v58  ;;  %v1225_v58 = vld [vmem:[%s1829_s22 + $0x20] sm:$0xff] }
  0x54   : > { %571 = vmatpush.bf16.msra.mxu1 %v1081_v62  ;;  %895 = vmatpush.bf16.msra.mxu2 %v1225_v58 }
  0x55   : > { %909 = vmatpush.bf16.msra.mxu3 %v1233_v59 }
  0x57   : > { %558 = vmatpush.bf16.msra.mxu0 %v1069_v4 }
  0x58   : > { %572 = vmatpush.bf16.msra.mxu1 %v1073_v6 }
  0xae   : > { %v383_v11 = vpop.xlane.xlu0 %382 }
  0xaf   : > { %v393_v12 = vmul.f32 %v1761_v10, %v383_v11 }
  0xb1   : > { %v1765_v13 = vsub.f32 %v1755_v2, %v393_v12 }
  0xb3   : > { %v397_v14 = vmul.f32 %v1765_v13, %v1765_v13 }
  0xb5   : > { %399 = vadd.xlane.f32.xlu1 %v397_v14 }
  0xb6   : > { %v385_v15 = vpop.xlane.xlu0 %384 }
  0xb7   : > { %v394_v16 = vmul.f32 %v1761_v10, %v385_v15 }
  0xb9   : > { %v1771_v17 = vsub.f32 %v1758_v3, %v394_v16 }
  0xbb   : > { %v398_v18 = vmul.f32 %v1771_v17, %v1771_v17 }
  0xbd   : > { %401 = vadd.xlane.f32.xlu1 %v398_v18 }
 0x128   : > { %v400_v1 = vpop.xlane.xlu1 %399 }
 0x129   : > { %v403_v5 = vmul.f32 %v400_v1, %v1761_v10 }
 0x12b   : > { %v405_v7 = vadd.f32 1e-05, %v403_v5 }
 0x12d   : > { %1345 = vrsqrt.f32 %v405_v7  ;;  %vm413_vm2 = vweird.f32 %v405_v7 }
 0x130   : > { %v402_v8 = vpop.xlane.xlu1 %401 }
 0x131   : > { %v404_v9 = vmul.f32 %v402_v8, %v1761_v10 }
 0x133   : > { %v1346_v11 = vpop.eup %1345  ;;  %v406_v12 = vadd.f32 1e-05, %v404_v9  ;;  %v1224_v9 = vld [vmem:[%s1829_s22 + $0x18] sm:$0xff] }
 0x134   : > { %v408_v14 = vmul.f32 %v1346_v11, %v405_v7  ;;  %vm414_vm1 = vweird.f32 %v1346_v11  ;;  %896 = vmatpush.bf16.msra.mxu2 %v1224_v9 }
 0x135   : > { %1347 = vrsqrt.f32 %v406_v12  ;;  %vm415_vm3 = vmor %vm413_vm2, %vm414_vm1  ;;  %vm423_vm5 = vweird.f32 %v406_v12 }
 0x136   : > { %v409_v15 = vmul.f32 %v1346_v11, %v408_v14 }
 0x138   : > { %v410_v16 = vmul.f32 0.5, %v409_v15 }
 0x13a   : > { %v411_v18 = vsub.f32 1.5, %v410_v16 }
 0x13b   : > { %v1348_v19 = vpop.eup %1347 }
 0x13c   : > { %v412_v20 = vmul.f32 %v1346_v11, %v411_v18  ;;  %v418_v21 = vmul.f32 %v1348_v19, %v406_v12  ;;  %vm424_vm4 = vweird.f32 %v1348_v19 }
 0x13d   : > { %vm425_vm6 = vmor %vm423_vm5, %vm424_vm4 }
 0x13e   : > { %v419_v22 = vmul.f32 %v1348_v19, %v418_v21  ;;  %v416_v24 = vsel %vm415_vm3, %v1346_v11, %v412_v20  ;;  %v1232_v11 = vld [vmem:[%s1829_s22 + $0x58] sm:$0xff]  ;;  %v1223_v20 = vld [vmem:[%s1829_s22 + $0x10] sm:$0xff] }
 0x13f   : > { %v427_v10 = vmul.f32 %v416_v24, %v1765_v13  ;;  %v465_v13 = vld [vmem:[%s464_s17] sm:$0x3]  ;;  %v1231_v21 = vld [vmem:[%s1829_s22 + $0x50] sm:$0xff]  ;;  %910 = vmatpush.bf16.msra.mxu3 %v1232_v11  ;;  %897 = vmatpush.bf16.msra.mxu2 %v1223_v20 }
 0x140   : > { %v420_v23 = vmul.f32 0.5, %v419_v22  ;;  %v467_v36 = vperm.slane %v465_v13, 0  ;;  %v468_v37 = vperm.slane %v465_v13, 1  ;;  %v1222_v13 = vld [vmem:[%s1829_s22 + $0x8] sm:$0xff] }
 0x141   : > { %v434_v30 = vmul.f32 %v1340_v26, %v427_v10 }
 0x142   : > { %v421_v25 = vsub.f32 1.5, %v420_v23 }
 0x143   : > { %v441_v33 = vadd.f32 %v1341_v31, %v434_v30  ;;  %911 = vmatpush.bf16.msra.mxu3 %v1231_v21  ;;  %898 = vmatpush.bf16.msra.mxu2 %v1222_v13 }
 0x144   : > { %v422_v27 = vmul.f32 %v1348_v19, %v421_v25 }
 0x146   : > { %v426_v28 = vsel %vm425_vm6, %v1348_v19, %v422_v27 }
 0x147   : > { %v428_v29 = vmul.f32 %v426_v28, %v1771_v17  ;;  %899 = vmatpush.bf16.msra.mxu2 %v1221_v45 }
 0x149   : > { %v435_v32 = vmul.f32 %v1340_v26, %v428_v29 }
 0x14b   : > { %v442_v34 = vadd.f32 %v1341_v31, %v435_v32 }
 0x14d   : > { %v443_v35 = vpack.c.bf16 %v442_v34, %v441_v33 }
 0x14f   : > { %559 = vmatmul.bf16.vlgmr.msra.gmra.mxu0 %v443_v35  ;;  %573 = vmatmul.bf16.vlgmr.msra.gmra.mxu1 %v443_v35 }
 0x1cc   : > { %v560_v17 = vpop.f32.mrf.mxu0  ;;  %v574_v38 = vpop.f32.mrf.mxu1 }
 0x1cd   : > { %v1833_v41 = vadd.f32 %v560_v17, %v467_v36  ;;  %v1835_v42 = vadd.f32 %v574_v38, %v468_v37 }
 0x1cf   : > { %v1838_v43 = vmul.f32 0.70710677, %v1833_v41  ;;  %v1841_v44 = vmul.f32 0.70710677, %v1835_v42 }
 0x1d1   : > { %v587_v47 = vmul.f32 %v1838_v43, %v1838_v43  ;;  %v627_v48 = vmul.f32 %v1841_v44, %v1841_v44 }
 0x1d3   : > { %v1851_v51 = vmin.f32 %v587_v47, 16.0  ;;  %v1853_v52 = vmin.f32 %v627_v48, 16.0 }
 0x1d4   : > { %v562_v53 = vpop.f32.mrf.mxu0  ;;  %v576_v54 = vpop.f32.mrf.mxu1 }
 0x1d5   : > { %v589_v55 = vmul.f32 2.1237322e-06, %v1851_v51  ;;  %v1856_v56 = vadd.f32 %v562_v53, %v467_v36  ;;  %v1858_v57 = vadd.f32 %v576_v54, %v468_v37  ;;  %v600_v60 = vmul.f32 3.8918573e-05, %v1851_v51  ;;  %v1230_v36 = vld [vmem:[%s1829_s22 + $0x48] sm:$0xff] }
 0x1d6   : > { %v640_v61 = vmul.f32 3.8918573e-05, %v1853_v52  ;;  %v629_v5 = vmul.f32 2.1237322e-06, %v1853_v52  ;;  %912 = vmatpush.bf16.msra.mxu3 %v1230_v36 }
 0x1d7   : > { %v590_v62 = vadd.f32 0.00028619796, %v589_v55  ;;  %v1865_v63 = vmul.f32 0.70710677, %v1856_v56  ;;  %v1868_v0 = vmul.f32 0.70710677, %v1858_v57 }
 0x1d8   : > { %v601_v1 = vadd.f32 0.001143296, %v600_v60  ;;  %v641_v6 = vadd.f32 0.001143296, %v640_v61  ;;  %v630_v19 = vadd.f32 0.00028619796, %v629_v5 }
 0x1d9   : > { %v591_v4 = vmul.f32 %v590_v62, %v1851_v51  ;;  %v667_v7 = vmul.f32 %v1865_v63, %v1865_v63  ;;  %v707_v8 = vmul.f32 %v1868_v0, %v1868_v0 }
 0x1da   : > { %v602_v12 = vmul.f32 %v601_v1, %v1851_v51  ;;  %v642_v14 = vmul.f32 %v641_v6, %v1853_v52  ;;  %v631_v31 = vmul.f32 %v630_v19, %v1853_v52  ;;  %913 = vmatpush.bf16.msra.mxu3 %v1229_v46 }
 0x1db   : > { %v1880_v15 = vmin.f32 %v667_v7, 16.0  ;;  %v1882_v16 = vmin.f32 %v707_v8, 16.0  ;;  %v592_v23 = vadd.f32 0.0036580483, %v591_v4 }
 0x1dc   : > { %v603_v18 = vadd.f32 0.014752088, %v602_v12  ;;  %v643_v22 = vadd.f32 0.014752088, %v642_v14  ;;  %v632_v55 = vadd.f32 0.0036580483, %v631_v31 }
 0x1dd   : > { %v669_v24 = vmul.f32 2.1237322e-06, %v1880_v15  ;;  %v680_v10 = vmul.f32 3.8918573e-05, %v1880_v15  ;;  %v720_v27 = vmul.f32 3.8918573e-05, %v1882_v16  ;;  %v593_v34 = vmul.f32 %v592_v23, %v1851_v51 }
 0x1de   : > { %v604_v25 = vmul.f32 %v603_v18, %v1851_v51  ;;  %v644_v26 = vmul.f32 %v643_v22, %v1853_v52  ;;  %v709_v29 = vmul.f32 2.1237322e-06, %v1882_v16  ;;  %v633_v8 = vmul.f32 %v632_v55, %v1853_v52 }
 0x1df   : > { %v670_v28 = vadd.f32 0.00028619796, %v669_v24  ;;  %v681_v32 = vadd.f32 0.001143296, %v680_v10  ;;  %v721_v17 = vadd.f32 0.001143296, %v720_v27 }
 0x1e0   : > { %v605_v30 = vadd.f32 0.112945676, %v604_v25  ;;  %v645_v33 = vadd.f32 0.112945676, %v644_v26  ;;  %v710_v40 = vadd.f32 0.00028619796, %v709_v29 }
 0x1e1   : > { %v671_v35 = vmul.f32 %v670_v28, %v1880_v15  ;;  %v682_v38 = vmul.f32 %v681_v32, %v1880_v15  ;;  %v722_v48 = vmul.f32 %v721_v17, %v1882_v16  ;;  %v594_v54 = vadd.f32 0.05243302, %v593_v34 }
 0x1e2   : > { %v606_v37 = vmul.f32 %v605_v30, %v1851_v51  ;;  %v646_v39 = vmul.f32 %v645_v33, %v1853_v52  ;;  %v711_v62 = vmul.f32 %v710_v40, %v1882_v16  ;;  %v634_v20 = vadd.f32 0.05243302, %v633_v8 }
 0x1e3   : > { %v672_v49 = vadd.f32 0.0036580483, %v671_v35  ;;  %v683_v50 = vadd.f32 0.014752088, %v682_v38  ;;  %v723_v59 = vadd.f32 0.014752088, %v722_v48  ;;  %v595_v7 = vmul.f32 %v594_v54, %v1851_v51 }
 0x1e4   : > { %v607_v47 = vadd.f32 0.4994258, %v606_v37  ;;  %v647_v53 = vadd.f32 0.4994258, %v646_v39  ;;  %v712_v12 = vadd.f32 0.0036580483, %v711_v62  ;;  %v635_v30 = vmul.f32 %v634_v20, %v1853_v52 }
 0x1e5   : > { %v684_v60 = vmul.f32 %v683_v50, %v1880_v15  ;;  %v673_v4 = vmul.f32 %v672_v49, %v1880_v15  ;;  %v724_v9 = vmul.f32 %v723_v59, %v1882_v16  ;;  %v596_v19 = vadd.f32 0.18741608, %v595_v7 }
 0x1e6   : > { %v608_v58 = vmul.f32 %v607_v47, %v1851_v51  ;;  %v648_v61 = vmul.f32 %v647_v53, %v1853_v52  ;;  %v713_v24 = vmul.f32 %v712_v12, %v1882_v16  ;;  %v636_v38 = vadd.f32 0.18741608, %v635_v30 }
 0x1e7   : > { %v685_v5 = vadd.f32 0.112945676, %v684_v60  ;;  %v674_v14 = vadd.f32 0.05243302, %v673_v4  ;;  %v725_v21 = vadd.f32 0.112945676, %v724_v9  ;;  %v597_v29 = vmul.f32 %v596_v19, %v1851_v51 }
 0x1e8   : > { %v609_v1 = vadd.f32 1.0, %v608_v58  ;;  %v1908_v6 = vadd.f32 1.0, %v648_v61  ;;  %v714_v33 = vadd.f32 0.05243302, %v713_v24  ;;  %v637_v55 = vmul.f32 %v636_v38, %v1853_v52 }
 0x1e9   : > { %v686_v11 = vmul.f32 %v685_v5, %v1880_v15  ;;  %v726_v25 = vmul.f32 %v725_v21, %v1882_v16  ;;  %v675_v26 = vmul.f32 %v674_v14, %v1880_v15  ;;  %v598_v17 = vadd.f32 1.1283791, %v597_v29 }
 0x1ea   : > { %1349 = vrcp.f32 %v609_v1  ;;  %v621_v37 = vand.u32 2147483648, %v609_v1  ;;  %v619_v39 = vand.u32 2147483647, %v609_v1  ;;  %vm615_vm8 = vweird.f32 %v609_v1 }
 0x1eb   : > { %1351 = vrcp.f32 %v1908_v6  ;;  %v687_v18 = vadd.f32 0.4994258, %v686_v11  ;;  %v727_v35 = vadd.f32 0.4994258, %v726_v25  ;;  %v676_v13 = vadd.f32 0.18741608, %v675_v26 }
 0x1ec   : > { %v715_v46 = vmul.f32 %v714_v33, %v1882_v16  ;;  %v622_v53 = vor.u32 1.1754944e-38, %v621_v37  ;;  %v599_v54 = vmul.f32 %v598_v17, %v1838_v43  ;;  %vm620_vm10 = vcmp.eq.f32.partialorder %v619_v39, 8.507059e+37 }
 0x1ed   : > { %v688_v22 = vmul.f32 %v687_v18, %v1880_v15  ;;  %v728_v40 = vmul.f32 %v727_v35, %v1882_v16  ;;  %v677_v49 = vmul.f32 %v676_v13, %v1880_v15  ;;  %v661_v15 = vand.u32 2147483648, %v1908_v6 }
 0x1ee   : > { %v716_v61 = vadd.f32 0.18741608, %v715_v46  ;;  %vm655_vm12 = vweird.f32 %v1908_v6  ;;  %v638_v9 = vadd.f32 1.1283791, %v637_v55  ;;  %v579_v33 = vmul.f32 0.5, %v1833_v41 }
 0x1ef   : > { %v689_v28 = vadd.f32 1.0, %v688_v22  ;;  %v1928_v47 = vadd.f32 1.0, %v728_v40  ;;  %v678_v4 = vadd.f32 1.1283791, %v677_v49  ;;  %v662_v18 = vor.u32 1.1754944e-38, %v661_v15 }
 0x1f0   : > { %v1350_v23 = vpop.eup %1349  ;;  %v717_v12 = vmul.f32 %v716_v61, %v1882_v16  ;;  %v639_v25 = vmul.f32 %v638_v9, %v1841_v44  ;;  %v580_v46 = vmul.f32 0.5, %v1835_v42 }
 0x1f1   : > { %v1918_v10 = vpop.eup %1351  ;;  %v611_v27 = vmul.f32 %v1350_v23, %v609_v1  ;;  %1353 = vrcp.f32 %v689_v28  ;;  %vm616_vm7 = vweird.f32 %v1350_v23  ;;  %v659_v1 = vand.u32 2147483647, %v1908_v6 }
 0x1f2   : > { %v651_v31 = vmul.f32 %v1918_v10, %v1908_v6  ;;  %vm617_vm9 = vmor %vm615_vm8, %vm616_vm7  ;;  %vm656_vm11 = vweird.f32 %v1918_v10  ;;  %1355 = vrcp.f32 %v1928_v47  ;;  %v699_v5 = vand.u32 2147483647, %v689_v28 }
 0x1f3   : > { %v612_v32 = vsub.f32 1.0, %v611_v27  ;;  %v701_v43 = vand.u32 2147483648, %v689_v28  ;;  %vm1939_vm14 = vmor %vm655_vm12, %vm656_vm11  ;;  %vm695_vm15 = vweird.f32 %v689_v28  ;;  %v679_v6 = vmul.f32 %v678_v4, %v1865_v63 }
 0x1f4   : > { %v652_v34 = vsub.f32 1.0, %v651_v31  ;;  %vm700_vm1 = vcmp.eq.f32.partialorder %v699_v5, 8.507059e+37  ;;  %vm660_vm2 = vcmp.eq.f32.partialorder %v659_v1, 8.507059e+37  ;;  %v718_v27 = vadd.f32 1.1283791, %v717_v12 }
 0x1f5   : > { %v613_v36 = vmul.f32 %v1350_v23, %v612_v32  ;;  %v702_v20 = vor.u32 1.1754944e-38, %v701_v43  ;;  %v739_v29 = vand.u32 2147483647, %v1928_v47  ;;  %v741_v63 = vand.u32 2147483648, %v1928_v47 }
 0x1f6   : > { %v653_v45 = vmul.f32 %v1918_v10, %v652_v34  ;;  %v581_v34 = vmul.f32 0.5, %v1856_v56  ;;  %vm735_vm4 = vweird.f32 %v1928_v47  ;;  %v719_v44 = vmul.f32 %v718_v27, %v1868_v0 }
 0x1f7   : > { %v614_v51 = vadd.f32 %v1350_v23, %v613_v36  ;;  %v1354_v48 = vpop.eup %1353  ;;  %v742_v37 = vor.u32 1.1754944e-38, %v741_v63  ;;  %vm740_vm6 = vcmp.eq.f32.partialorder %v739_v29, 8.507059e+37 }
 0x1f8   : > { %v691_v58 = vmul.f32 %v1354_v48, %v689_v28  ;;  %v654_v60 = vadd.f32 %v1918_v10, %v653_v45  ;;  %vm696_vm13 = vweird.f32 %v1354_v48  ;;  %v1356_v19 = vpop.eup %1355 }
 0x1f9   : > { %v618_v50 = vsel %vm617_vm9, %v1350_v23, %v614_v51  ;;  %vm697_vm0 = vmor %vm695_vm15, %vm696_vm13  ;;  %v731_v24 = vmul.f32 %v1356_v19, %v1928_v47  ;;  %vm736_vm3 = vweird.f32 %v1356_v19  ;;  %v582_v47 = vmul.f32 0.5, %v1858_v57 }
 0x1fa   : > { %v623_v59 = vsel %vm620_vm10, %v622_v53, %v618_v50  ;;  %v692_v62 = vsub.f32 1.0, %v691_v58  ;;  %v658_v11 = vsel %vm1939_vm14, %v1918_v10, %v654_v60  ;;  %vm737_vm5 = vmor %vm735_vm4, %vm736_vm3 }
 0x1fb   : > { %v624_v52 = vmul.f32 %v623_v59, %v599_v54  ;;  %v663_v23 = vsel %vm660_vm2, %v662_v18, %v658_v11  ;;  %v732_v16 = vsub.f32 1.0, %v731_v24  ;;  %v1342_v54 = vld [vmem:[%s791_s19] ss:$0 sm:$0xff] }
 0x1fc   : > { %v693_v7 = vmul.f32 %v1354_v48, %v692_v62  ;;  %v664_v28 = vmul.f32 %v663_v23, %v639_v25 }
 0x1fd   : > { %v1130_v21 = vclamps-f32 %v624_v52, 1.0  ;;  %v733_v32 = vmul.f32 %v1356_v19, %v732_v16 }
 0x1fe   : > { %v694_v14 = vadd.f32 %v1354_v48, %v693_v7  ;;  %v1131_v36 = vclamps-f32 %v664_v28, 1.0 }
 0x1ff   : > { %v747_v31 = vadd.f32 1.0, %v1130_v21  ;;  %v734_v13 = vadd.f32 %v1356_v19, %v733_v32 }
 0x200   : > { %v698_v22 = vsel %vm697_vm0, %v1354_v48, %v694_v14  ;;  %v748_v56 = vadd.f32 1.0, %v1131_v36 }
 0x201   : > { %v703_v10 = vsel %vm700_vm1, %v702_v20, %v698_v22  ;;  %v751_v17 = vmul.f32 %v747_v31, %v579_v33  ;;  %v738_v39 = vsel %vm737_vm5, %v1356_v19, %v734_v13 }
 0x202   : > { %v704_v26 = vmul.f32 %v703_v10, %v679_v6  ;;  %v743_v40 = vsel %vm740_vm6, %v742_v37, %v738_v39  ;;  %v752_v0 = vmul.f32 %v748_v56, %v580_v46 }
 0x203   : > { %v744_v45 = vmul.f32 %v743_v40, %v719_v44 }
 0x204   : > { %v1132_v30 = vclamps-f32 %v704_v26, 1.0 }
 0x205   : > { %v1133_v41 = vclamps-f32 %v744_v45, 1.0 }
 0x206   : > { %v749_v35 = vadd.f32 1.0, %v1132_v30 }
 0x207   : > { %v750_v48 = vadd.f32 1.0, %v1133_v41 }
 0x208   : > { %v753_v38 = vmul.f32 %v749_v35, %v581_v34 }
 0x209   : > { %v754_v49 = vmul.f32 %v750_v48, %v582_v47 }
 0x20a   : > { %v755_v51 = vpack.c.bf16 %v753_v38, %v751_v17 }
 0x20b   : > { %v756_v50 = vpack.c.bf16 %v754_v49, %v752_v0 }
 0x20c   : > { %900 = vmatmul.bf16.vlgmr.msra.gmra.mxu2 %v755_v51 }
 0x20d   : > { %914 = vmatmul.bf16.vlgmr.msra.gmra.mxu3 %v756_v50 }
 0x28f   : > { %v901_v53 = vpop.f32.mrf.mxu2 }
 0x290   : > { %v902_v55 = vadd.f32 %v1342_v54, %v901_v53  ;;  %v915_v58 = vpop.f32.mrf.mxu3 }
 0x292   : > { %v916_v59 = vadd.f32 %v915_v58, %v902_v55 }
 0x294   : > { %v920_v42 = vadd.f32 %v916_v59, %v1755_v2 }
 0x296   : > { %922 = vst [vmem:[#allocation13] sm:$0xff] %v920_v42 }
 0x297   : > { %v903_v60 = vpop.f32.mrf.mxu2 }
 0x298   : > { %v904_v57 = vadd.f32 %v1342_v54, %v903_v60  ;;  %v917_v61 = vpop.f32.mrf.mxu3 }
 0x29a   : > { %v918_v62 = vadd.f32 %v917_v61, %v904_v57 }
 0x29c   : > { %v921_v1 = vadd.f32 %v918_v62, %v1758_v3 }
 0x29e   : > { %923 = vst [vmem:[#allocation13 + $0x8] sm:$0xff] %v921_v1 }
 0x29f   : > { %1262 = dma.vmem_to_hbm [thread:$0]  (%p1296_p8), %s933_s16, 256, %s935_s27, [#allocation4], %s1625_s24, %s1625_s24, %s1626_s29  }
 0x2a0   : > { %1594 = dma.done.wait (%p1296_p8), [#allocation4], 256  }
 0x2a1   : > { %1596 = vsyncadd (%p1296_p8), [#allocation4], 4294967040 }
 0x2a2 PF: > { %s22_s26 = sadd.s32 1, %s1607_s26   ;;  %s1996_s24 = smov %s1603_s25 }
 0x2a3   : > { %p19_p9 = scmp.ge.s32.totalorder %s22_s26, 5   ;;  %s1997_s25 = smov %s1999_s28 }
 0x2a5   :  { %21 = sbr.rel (!%p19_p9) target bundleno = 8 (0x8), region = 109 }
 0x2aa   :  { %951 = vsyncpa [#allocation3], 1 }
 0x2ab   :  { %953 = vsyncpa [#allocation3 + $0x1], 1 }
 0x2ac   :  { %954 = vsyncpa [#allocation6], 1 }
 0x2ad   :  { %955 = vsyncpa [#allocation9], 1 }
 0x2ae   :  { %956 = vsyncpa [#allocation12], 1 }
 0x2af   :  { %957 = vsyncpa [#allocation4], 1 }
 0x2b0   :  { %959 = vsyncpa [#allocation4 + $0x1], 1 }

</bundles_post_ra>
